<compile_context>
chip_gen: v7x
topology: tpu7x:2x2x1
jax: 0.10.0
libtpu: 0.0.40
codegen_flags: <defaults>
</compile_context>

<pallas_src>
import jax
import jax.numpy as jnp
from jax.experimental import pallas as pl
from jax.experimental.pallas import tpu as pltpu


def _round_up(x: int, m: int) -> int:
    return (x + m - 1) // m * m


def _chip_config():
    """Per-generation split count and VMEM budget.

    v7x: 2 TensorCores/chip, 64 MiB physical VMEM per TC -> 2-way split, small budget.
    v5e/v6e (and unknown): 1 TC, 128 MiB VMEM -> single split, larger budget.
    """
    try:
        kind = jax.devices()[0].device_kind.lower()
    except Exception:
        kind = ""
    if "v7" in kind or "7x" in kind:
        return {"nsplit": 2, "budget_bytes": 20 << 20, "vmem_limit": 30 << 20}
    return {"nsplit": 1, "budget_bytes": 36 << 20, "vmem_limit": 48 << 20}


def _make_focal_kernel(gamma: float, tile_n: int, n_rows: int):
    def kernel(logits_ref, target_ref, wrow_ref, num_ref, den_ref):
        j = pl.program_id(1)

        @pl.when(j == 0)
        def _init():
            num_ref[...] = jnp.zeros_like(num_ref)
            den_ref[...] = jnp.zeros_like(den_ref)

        # Global (UNclamped) row-tile index -> row-validity mask. This covers
        # both the partial last tile and the fully-OOB tiles of the last split
        # (whose index_map is clamped to a valid tile in the wrapper).
        blk = pl.program_id(0) * pl.num_programs(1) + j
        row0 = blk * tile_n
        row_ids = row0 + jax.lax.broadcasted_iota(jnp.int32, (tile_n, 1), 0)
        row_valid = row_ids < n_rows                                   # [TN, 1]

        x = logits_ref[...].astype(jnp.float32)                        # [TN, C]
        # Sanitize garbage tail rows BEFORE the exp so stale VMEM junk can't NaN.
        x = jnp.where(row_valid, x, 0.0)
        t = target_ref[...]                                            # [TN, 1] int32
        w = wrow_ref[...]                                              # [TN, 1] f32 = weight[target]

        # Row-wise log-softmax statistics; single full-tile exp, fused chain.
        m = jnp.max(x, axis=1, keepdims=True)                          # [TN, 1]
        lse = jnp.log(jnp.sum(jnp.exp(x - m), axis=1, keepdims=True))  # [TN, 1]

        # Gather the target logit with one masked reduce (no per-row dynamic index).
        col = jax.lax.broadcasted_iota(jnp.int32, x.shape, 1)
        x_t = jnp.sum(jnp.where(col == t, x, 0.0), axis=1, keepdims=True)  # [TN, 1]

        # Focal modulation only on the gathered [TN, 1] column.
        logpt_t = x_t - m - lse
        one_minus_pt = 1.0 - jnp.exp(logpt_t)   # matches reference; -expm1 would
                                                # be more accurate near pt -> 1
        if gamma == 2.0:
            mod = one_minus_pt * one_minus_pt
        elif gamma == 1.0:
            mod = one_minus_pt
        elif gamma == 0.0:
            mod = jnp.ones_like(one_minus_pt)
        else:
            mod = one_minus_pt ** gamma
        focal_t = mod * logpt_t                                        # [TN, 1]

        # Weighted NLL partial sums, accumulated in resident (1,1,1) output blocks.
        num_ref[...] += jnp.sum(jnp.where(row_valid, w * (-focal_t), 0.0))
        den_ref[...] += jnp.sum(jnp.where(row_valid, w, 0.0))

    return kernel


def focal_loss(logits: jax.Array, target: jax.Array, weight=None, gamma=2.0, *,
               _tile_n_override=None, _nsplit_override=None):
    """logits: [N, C] float (f32 or bf16), target: [N] int, weight: [C] or None."""
    N, C = logits.shape
    in_dtype = logits.dtype                      # DMA in native dtype, upcast in-kernel
    itemsize = jnp.dtype(in_dtype).itemsize
    c_lanes = _round_up(C, 128)                  # physical lane footprint (sizing only)

    # --- per-row weight gather in the wrapper (trivial [N] HBM traffic) -------
    target_k = jnp.clip(target.astype(jnp.int32), 0, C - 1)
    if weight is None:
        w_row = jnp.ones((N,), jnp.float32)
    else:
        w_row = weight.astype(jnp.float32)[target_k]
    # TODO(synk): like the PyTorch module's nll_loss we do NOT raise on
    # out-of-range targets; they silently contribute zero loss (weight -> 0).
    valid_t = (target >= 0) & (target < C)
    w_row = jnp.where(valid_t, w_row, 0.0)

    cfg = _chip_config()
    nsplit = _nsplit_override if _nsplit_override is not None else cfg["nsplit"]

    # --- row tile: byte-targeted against physical VMEM footprint --------------
    if _tile_n_override is not None:
        tile_n = int(_tile_n_override)
    else:
        # Per tile row: double-buffered native logits (lane-padded) +
        # double-buffered lane-padded (·,1) target & weight + ~4 full-tile f32 temps.
        per_row = 2 * c_lanes * itemsize + 2 * 2 * 128 * 4 + 4 * c_lanes * 4
        tile_n = max(8, (cfg["budget_bytes"] // per_row) // 8 * 8)
        tile_n = min(tile_n, _round_up(N, 8))

    n_tiles = pl.cdiv(N, tile_n)
    nsplit = max(1, min(nsplit, n_tiles))
    tps = pl.cdiv(n_tiles, nsplit)               # tiles handled per split
    last_tile = n_tiles - 1

    def row_map(i, j):
        # Clamp so the (rare) fully-OOB tiles of the last split re-read a valid
        # tile; the kernel's row_valid mask (built from the UNclamped index)
        # zeroes their contribution, so nothing is double counted.
        return (jnp.minimum(i * tps + j, last_tile), 0)

    num_p, den_p = pl.pallas_call(
        _make_focal_kernel(float(gamma), tile_n, N),
        out_shape=(jax.ShapeDtypeStruct((nsplit, 1, 1), jnp.float32),
                   jax.ShapeDtypeStruct((nsplit, 1, 1), jnp.float32)),
        grid_spec=pltpu.PrefetchScalarGridSpec(
            num_scalar_prefetch=0,
            grid=(nsplit, tps),
            in_specs=[
                pl.BlockSpec((tile_n, C), row_map),   # logits, full (unpadded) class width
                pl.BlockSpec((tile_n, 1), row_map),   # targets
                pl.BlockSpec((tile_n, 1), row_map),   # per-row weights
            ],
            out_specs=(
                pl.BlockSpec((1, 1, 1), lambda i, j: (i, 0, 0)),
                pl.BlockSpec((1, 1, 1), lambda i, j: (i, 0, 0)),
            ),
        ),
        compiler_params=pltpu.CompilerParams(
            dimension_semantics=("parallel", "arbitrary"),
            vmem_limit_bytes=cfg["vmem_limit"],
        ),
    )(logits, target_k.reshape(N, 1), w_row.reshape(N, 1))

    # Combine per-split partials (cross-core reduction) with a scalar divide.
    return jnp.sum(num_p) / jnp.sum(den_p)


def _focal_loss_ref(logits, target, weight=None, gamma=2.0):
    """Pure-JAX reference matching the PyTorch module."""
    logpt = jax.nn.log_softmax(logits.astype(jnp.float32), axis=1)
    pt = jnp.exp(logpt)
    focal = (1.0 - pt) ** gamma * logpt
    N, C = logits.shape
    if weight is None:
        weight = jnp.ones((C,), jnp.float32)
    picked = focal[jnp.arange(N), target]
    w = weight.astype(jnp.float32)[target]
    return jnp.sum(w * (-picked)) / jnp.sum(w)


if __name__ == "__main__":
    key = jax.random.PRNGKey(0)
    k1, k2 = jax.random.split(key)

    # 1) Small shapes consistent with the module: batch=8, num_classes=16.
    N, C = 8, 16
    logits = jax.random.normal(k1, (N, C), dtype=jnp.float32)
    target = jax.random.randint(k2, (N,), 0, C, dtype=jnp.int32)
    loss = jax.block_until_ready(focal_loss(logits, target))      # weight=None
    ref = _focal_loss_ref(logits, target)
    assert jnp.allclose(loss, ref, rtol=1e-5, atol=1e-5), (loss, ref)

    # 2) Explicit class weights + batch not a multiple of 8 (partial tail tile).
    k3, k4, k5 = jax.random.split(k1, 3)
    N2, C2 = 37, 10
    logits2 = jax.random.normal(k3, (N2, C2), dtype=jnp.float32)
    target2 = jax.random.randint(k4, (N2,), 0, C2, dtype=jnp.int32)
    w2 = jax.random.uniform(k5, (C2,), dtype=jnp.float32) + 0.5
    loss2 = jax.block_until_ready(focal_loss(logits2, target2, w2))
    ref2 = _focal_loss_ref(logits2, target2, w2)
    assert jnp.allclose(loss2, ref2, rtol=1e-5, atol=1e-5), (loss2, ref2)

    # 3) Force the multi-tile + 2-way-split path (exercises accumulation across
    #    the "arbitrary" axis, the clamped OOB tile and the row-validity mask)
    #    even on single-TC chips.
    k6, k7, k8 = jax.random.split(k2, 3)
    N3, C3 = 100, 10
    logits3 = jax.random.normal(k6, (N3, C3), dtype=jnp.float32)
    target3 = jax.random.randint(k7, (N3,), 0, C3, dtype=jnp.int32)
    w3 = jax.random.uniform(k8, (C3,), dtype=jnp.float32) + 0.5
    loss3 = jax.block_until_ready(
        focal_loss(logits3, target3, w3, _tile_n_override=16, _nsplit_override=2))
    ref3 = _focal_loss_ref(logits3, target3, w3)
    assert jnp.allclose(loss3, ref3, rtol=1e-5, atol=1e-5), (loss3, ref3)

    # 4) bf16 logits stay bf16 over HBM (upcast happens in-kernel).
    logits4 = jax.random.normal(k3, (64, 24), dtype=jnp.bfloat16)
    target4 = jax.random.randint(k4, (64,), 0, 24, dtype=jnp.int32)
    loss4 = jax.block_until_ready(focal_loss(logits4, target4, gamma=2.0))
    ref4 = _focal_loss_ref(logits4, target4, gamma=2.0)
    assert jnp.allclose(loss4, ref4, rtol=1e-3, atol=1e-3), (loss4, ref4)

    print("KERNEL_OK")
</pallas_src>

<mosaic_0001>
module attributes {stable_mosaic.version = 11 : i64} {
  func.func @kernel(%arg0: i32, %arg1: i32, %arg2: memref<8x16xf32, #tpu.memory_space<vmem>>, %arg3: memref<8x1xi32, #tpu.memory_space<vmem>>, %arg4: memref<8x1xf32, #tpu.memory_space<vmem>>, %arg5: memref<1x1x1xf32, #tpu.memory_space<vmem>>, %arg6: memref<1x1x1xf32, #tpu.memory_space<vmem>>) attributes {dimension_semantics = [#tpu.dimension_semantics<parallel>, #tpu.dimension_semantics<arbitrary>], iteration_bounds = array<i64: 1, 1>, scalar_prefetch = 0 : i64, scratch_operands = 0 : i64, tpu.core_type = #tpu.core_type<tc>, window_params = [{transform_indices = @transform_0, window_bounds = array<i64: 8, 16>}, {transform_indices = @transform_1, window_bounds = array<i64: 8, 1>}, {transform_indices = @transform_2, window_bounds = array<i64: 8, 1>}, {transform_indices = @transform_3, window_bounds = array<i64: 1, 1, 1>}, {transform_indices = @transform_4, window_bounds = array<i64: 1, 1, 1>}]} {
    %c0_i32 = arith.constant 0 : i32
    %0 = arith.cmpi eq, %arg1, %c0_i32 : i32
    %1 = arith.extui %0 : i1 to i32
    %c0_i32_0 = arith.constant 0 : i32
    %2 = arith.cmpi ne, %1, %c0_i32_0 : i32
    scf.if %2 {
      %cst_29 = arith.constant 0.000000e+00 : f32
      %63 = vector.broadcast %cst_29 : f32 to vector<1x1x1xf32>
      %c0_30 = arith.constant 0 : index
      %c0_31 = arith.constant 0 : index
      %c0_32 = arith.constant 0 : index
      %64 = vector.load %arg5[%c0_30, %c0_31, %c0_32] : memref<1x1x1xf32, #tpu.memory_space<vmem>>, vector<1x1x1xf32>
      tpu.vector_store %arg5[%c0_30, %c0_31, %c0_32], %63 {strides = array<i32>} : memref<1x1x1xf32, #tpu.memory_space<vmem>>, vector<1x1x1xf32>,
      %cst_33 = arith.constant 0.000000e+00 : f32
      %65 = vector.broadcast %cst_33 : f32 to vector<1x1x1xf32>
      %c0_34 = arith.constant 0 : index
      %c0_35 = arith.constant 0 : index
      %c0_36 = arith.constant 0 : index
      %66 = vector.load %arg6[%c0_34, %c0_35, %c0_36] : memref<1x1x1xf32, #tpu.memory_space<vmem>>, vector<1x1x1xf32>
      tpu.vector_store %arg6[%c0_34, %c0_35, %c0_36], %65 {strides = array<i32>} : memref<1x1x1xf32, #tpu.memory_space<vmem>>, vector<1x1x1xf32>,
    } else {
    }
    %c1_i32 = arith.constant 1 : i32
    %3 = arith.muli %arg0, %c1_i32 : i32
    %4 = arith.addi %3, %arg1 : i32
    %c8_i32 = arith.constant 8 : i32
    %5 = arith.muli %4, %c8_i32 : i32
    %6 = tpu.iota {dimensions = array<i32: 0>} : vector<8x1xi32>
    %7 = vector.broadcast %5 : i32 to vector<8x1xi32>
    %8 = arith.addi %7, %6 : vector<8x1xi32>
    %c8_i32_1 = arith.constant 8 : i32
    %9 = vector.broadcast %c8_i32_1 : i32 to vector<8x1xi32>
    %10 = arith.cmpi slt, %8, %9 : vector<8x1xi32>
    %c0 = arith.constant 0 : index
    %c0_2 = arith.constant 0 : index
    %11 = vector.load %arg2[%c0, %c0_2] : memref<8x16xf32, #tpu.memory_space<vmem>>, vector<8x16xf32>
    %cst = arith.constant 0.000000e+00 : f32
    %12 = vector.shape_cast %10 : vector<8x1xi1> to vector<8x1xi1>
    %13 = vector.broadcast %12 : vector<8x1xi1> to vector<8x16xi1>
    %14 = vector.broadcast %cst : f32 to vector<8x16xf32>
    %15 = arith.select %13, %11, %14 : vector<8x16xi1>, vector<8x16xf32>
    %c0_3 = arith.constant 0 : index
    %c0_4 = arith.constant 0 : index
    %16 = vector.load %arg3[%c0_3, %c0_4] : memref<8x1xi32, #tpu.memory_space<vmem>>, vector<8x1xi32>
    %c0_5 = arith.constant 0 : index
    %c0_6 = arith.constant 0 : index
    %17 = vector.load %arg4[%c0_5, %c0_6] : memref<8x1xf32, #tpu.memory_space<vmem>>, vector<8x1xf32>
    %cst_7 = arith.constant dense<0xFF800000> : vector<8xf32>
    %18 = vector.multi_reduction <maximumf>, %15, %cst_7 [1] : vector<8x16xf32> to vector<8xf32>
    %19 = vector.shape_cast %18 : vector<8xf32> to vector<8x1xf32>
    %20 = vector.broadcast %19 : vector<8x1xf32> to vector<8x16xf32>
    %21 = arith.subf %15, %20 : vector<8x16xf32>
    %22 = math.exp %21 : vector<8x16xf32>
    %cst_8 = arith.constant dense<0.000000e+00> : vector<8xf32>
    %23 = vector.multi_reduction <add>, %22, %cst_8 [1] : vector<8x16xf32> to vector<8xf32>
    %24 = vector.shape_cast %23 : vector<8xf32> to vector<8x1xf32>
    %25 = math.log %24 : vector<8x1xf32>
    %26 = tpu.iota {dimensions = array<i32: 1>} : vector<8x16xi32>
    %27 = vector.broadcast %16 : vector<8x1xi32> to vector<8x16xi32>
    %28 = arith.cmpi eq, %26, %27 : vector<8x16xi32>
    %cst_9 = arith.constant 0.000000e+00 : f32
    %29 = vector.broadcast %cst_9 : f32 to vector<8x16xf32>
    %30 = arith.select %28, %15, %29 : vector<8x16xi1>, vector<8x16xf32>
    %cst_10 = arith.constant dense<0.000000e+00> : vector<8xf32>
    %31 = vector.multi_reduction <add>, %30, %cst_10 [1] : vector<8x16xf32> to vector<8xf32>
    %32 = vector.shape_cast %31 : vector<8xf32> to vector<8x1xf32>
    %33 = arith.subf %32, %19 : vector<8x1xf32>
    %34 = arith.subf %33, %25 : vector<8x1xf32>
    %35 = math.exp %34 : vector<8x1xf32>
    %cst_11 = arith.constant 1.000000e+00 : f32
    %36 = vector.broadcast %cst_11 : f32 to vector<8x1xf32>
    %37 = arith.subf %36, %35 : vector<8x1xf32>
    %38 = arith.mulf %37, %37 : vector<8x1xf32>
    %39 = arith.mulf %38, %34 : vector<8x1xf32>
    %c0_12 = arith.constant 0 : index
    %c0_13 = arith.constant 0 : index
    %c0_14 = arith.constant 0 : index
    %40 = vector.load %arg5[%c0_12, %c0_13, %c0_14] : memref<1x1x1xf32, #tpu.memory_space<vmem>>, vector<1x1x1xf32>
    %cst_15 = arith.constant 0.000000e+00 : f32
    %41 = vector.broadcast %cst_15 : f32 to vector<8x1xf32>
    %42 = arith.subf %41, %39 : vector<8x1xf32>
    %43 = arith.mulf %17, %42 : vector<8x1xf32>
    %cst_16 = arith.constant 0.000000e+00 : f32
    %44 = vector.broadcast %cst_16 : f32 to vector<8x1xf32>
    %45 = arith.select %10, %43, %44 : vector<8x1xi1>, vector<8x1xf32>
    %46 = vector.shape_cast %45 : vector<8x1xf32> to vector<1x8x1xf32>
    %cst_17 = arith.constant dense<0.000000e+00> : vector<1xf32>
    %47 = vector.multi_reduction <add>, %46, %cst_17 [1, 2] : vector<1x8x1xf32> to vector<1xf32>
    %48 = vector.shape_cast %47 : vector<1xf32> to vector<1x1x1xf32>
    %49 = vector.extract %48[0, 0, 0] : f32 from vector<1x1x1xf32>
    %50 = vector.broadcast %49 : f32 to vector<1x1x1xf32>
    %51 = arith.addf %40, %50 : vector<1x1x1xf32>
    %c0_18 = arith.constant 0 : index
    %c0_19 = arith.constant 0 : index
    %c0_20 = arith.constant 0 : index
    %52 = vector.load %arg5[%c0_18, %c0_19, %c0_20] : memref<1x1x1xf32, #tpu.memory_space<vmem>>, vector<1x1x1xf32>
    tpu.vector_store %arg5[%c0_18, %c0_19, %c0_20], %51 {strides = array<i32>} : memref<1x1x1xf32, #tpu.memory_space<vmem>>, vector<1x1x1xf32>,
    %c0_21 = arith.constant 0 : index
    %c0_22 = arith.constant 0 : index
    %c0_23 = arith.constant 0 : index
    %53 = vector.load %arg6[%c0_21, %c0_22, %c0_23] : memref<1x1x1xf32, #tpu.memory_space<vmem>>, vector<1x1x1xf32>
    %cst_24 = arith.constant 0.000000e+00 : f32
    %54 = vector.broadcast %cst_24 : f32 to vector<8x1xf32>
    %55 = arith.select %10, %17, %54 : vector<8x1xi1>, vector<8x1xf32>
    %56 = vector.shape_cast %55 : vector<8x1xf32> to vector<1x8x1xf32>
    %cst_25 = arith.constant dense<0.000000e+00> : vector<1xf32>
    %57 = vector.multi_reduction <add>, %56, %cst_25 [1, 2] : vector<1x8x1xf32> to vector<1xf32>
    %58 = vector.shape_cast %57 : vector<1xf32> to vector<1x1x1xf32>
    %59 = vector.extract %58[0, 0, 0] : f32 from vector<1x1x1xf32>
    %60 = vector.broadcast %59 : f32 to vector<1x1x1xf32>
    %61 = arith.addf %53, %60 : vector<1x1x1xf32>
    %c0_26 = arith.constant 0 : index
    %c0_27 = arith.constant 0 : index
    %c0_28 = arith.constant 0 : index
    %62 = vector.load %arg6[%c0_26, %c0_27, %c0_28] : memref<1x1x1xf32, #tpu.memory_space<vmem>>, vector<1x1x1xf32>
    tpu.vector_store %arg6[%c0_26, %c0_27, %c0_28], %61 {strides = array<i32>} : memref<1x1x1xf32, #tpu.memory_space<vmem>>, vector<1x1x1xf32>,
    return
  }
  func.func @transform_0(%arg0: i32, %arg1: i32) -> (i32, i32) {
    %c1_i32 = arith.constant 1 : i32
    %0 = arith.muli %arg0, %c1_i32 : i32
    %1 = arith.addi %0, %arg1 : i32
    %c0_i32 = arith.constant 0 : i32
    %2 = arith.minsi %1, %c0_i32 : i32
    %c0_i32_0 = arith.constant 0 : i32
    %c0_i32_1 = arith.constant 0 : i32
    return %2, %c0_i32_0 : i32, i32
  }
  func.func @transform_1(%arg0: i32, %arg1: i32) -> (i32, i32) {
    %c1_i32 = arith.constant 1 : i32
    %0 = arith.muli %arg0, %c1_i32 : i32
    %1 = arith.addi %0, %arg1 : i32
    %c0_i32 = arith.constant 0 : i32
    %2 = arith.minsi %1, %c0_i32 : i32
    %c0_i32_0 = arith.constant 0 : i32
    %c0_i32_1 = arith.constant 0 : i32
    return %2, %c0_i32_0 : i32, i32
  }
  func.func @transform_2(%arg0: i32, %arg1: i32) -> (i32, i32) {
    %c1_i32 = arith.constant 1 : i32
    %0 = arith.muli %arg0, %c1_i32 : i32
    %1 = arith.addi %0, %arg1 : i32
    %c0_i32 = arith.constant 0 : i32
    %2 = arith.minsi %1, %c0_i32 : i32
    %c0_i32_0 = arith.constant 0 : i32
    %c0_i32_1 = arith.constant 0 : i32
    return %2, %c0_i32_0 : i32, i32
  }
  func.func @transform_3(%arg0: i32, %arg1: i32) -> (i32, i32, i32) {
    %c0_i32 = arith.constant 0 : i32
    %c0_i32_0 = arith.constant 0 : i32
    %c0_i32_1 = arith.constant 0 : i32
    return %arg0, %c0_i32, %c0_i32_0 : i32, i32, i32
  }
  func.func @transform_4(%arg0: i32, %arg1: i32) -> (i32, i32, i32) {
    %c0_i32 = arith.constant 0 : i32
    %c0_i32_0 = arith.constant 0 : i32
    %c0_i32_1 = arith.constant 0 : i32
    return %arg0, %c0_i32, %c0_i32_0 : i32, i32, i32
  }
}

</mosaic_0001>

<bundles_post_ra>
// kernel: tpu_custom_call.1
= control target key start
LH: loop header
LB: loop body
LE: loop exit
PB: predicated region body
PF: predicated region fallthrough
CT: control target
= control target key end

     0   :  { %10 = vsyncpa [#allocation3], 0  ;;  %vm119_vm0 = vcmask 130048   ;;  %s360_s0 = inlined_call_operand.vmem [shape: f32[8,16], index: 0, kind: input, shape index: {}]   ;;  %s361_s1 = inlined_call_operand.vmem [shape: s32[8,1], index: 1, kind: input, shape index: {}]   ;;  %s362_s2 = inlined_call_operand.vmem [shape: f32[8,1], index: 2, kind: input, shape index: {}]   ;;  %s363_s3 = inlined_call_operand.hbm [shape: f32[1,1,1], index: 3, kind: output, shape index: {0}]   ;;  %s364_s4 = inlined_call_operand.hbm [shape: f32[1,1,1], index: 4, kind: output, shape index: {1}]  }
   0x1   :  { %v113_v0 = vld [vmem:[%s360_s0] sm:$0xff] }
   0x2   :  { %11 = vsyncpa [#allocation5], 0  ;;  %v120_v1 = vsel %vm119_vm0, %v113_v0, -inf  ;;  %v291_v2 = vmov 0   ;;  %v117_v3 = vld [vmem:[%s361_s1] sm:$0xff]  ;;  %v131_v7 = vlaneseq  ;;  %vm152_vm2 = vcmask 7168  }
   0x3   :  { %236 = vset.pattern.permute.xlu0 %v291_v2  ;;  %v118_v25 = vld [vmem:[%s362_s2] sm:$0xff]  ;;  %vm103_vm3 = vcmask 0   ;;  %v292_v30 = vmov 0.0   ;;  %s293_s2 = smov [#allocation2]   ;;  %s294_s21 = smov [#allocation4]  }
   0x4   :  { %121 = vmax.xlane.f32.xlu0 %v120_v1  ;;  %v132_v8 = vand.u32 127, %v131_v7  ;;  %v169_v29 = vsel %vm152_vm2, %v118_v25, 0.0  ;;  %104 = vst.msk [vmem:[#allocation2] sm:$0x1] %vm103_vm3, %v292_v30  ;;  %105 = vst.msk [vmem:[#allocation4] sm:$0x1] %vm103_vm3, %v292_v30 }
   0x5   :  { %s188_s19 = sshll.u32 %s293_s2, 4  ;;  %s198_s22 = sshll.u32 %s294_s21, 4  ;;  %s189_s19 = int_to_ptr.vmem [resolvable:$true] %s188_s19  ;;  %s199_s22 = int_to_ptr.vmem [resolvable:$true] %s198_s22 }
   0x6   :  { %s243_s24 = scalar_lea.vmem %s189_s19, 16  ;;  %s247_s25 = scalar_lea.vmem %s189_s19, 32 }
   0x7   :  { %p244_p0 = scmp.ne.s32.totalorder %s189_s19, %s243_s24  ;;  %p248_p1 = scmp.lt.s32.totalorder %s189_s19, %s189_s19 }
   0x8   :  { %p249_p2 = scmp.lt.s32.totalorder %s247_s25, %s243_s24 }
   0xa   :  { %p250_p3 = por %p249_p2, %p248_p1 }
   0xb   :  { %v148_v45 = vld [vmem:[#allocation2] sm:$0x1]  ;;  %v167_v48 = vld [vmem:[#allocation4] sm:$0x1] }
   0xc   :  { %p251_p4 = pnand %p250_p3, %p244_p0 }
  0x1a   :  { %134 = vperm.xlu0 %236, %v117_v3  }
  0x91   :  { %v122_v4 = vpop.xlane.xlu0 %121 }
  0x92   :  { %v123_v5 = vsub.f32 %v113_v0, %v122_v4 }
  0x94   :  { %v124_v6 = vmul.f32 1.442695, %v123_v5 }
  0x96   :  { %237 = vpow2.f32 %v124_v6 }
  0x99   :  { %v135_v9 = vpop.permute.xlu0 %134 }
  0x9a   :  { %vm136_vm1 = vcmp.eq.s32.totalorder %v132_v8, %v135_v9 }
  0x9b   :  { %v137_v11 = vsel %vm136_vm1, %v113_v0, 0.0 }
  0x9c   :  { %v138_v13 = vsel %vm119_vm0, %v137_v11, 0.0 }
  0xa0   :  { %v238_v10 = vpop.eup %237 }
  0xa1   :  { %v126_v12 = vsel %vm119_vm0, %v238_v10, 0.0 }
  0xa2   :  { %127 = vadd.xlane.f32.xlu1 %v126_v12 }
  0xa6   :  { %139 = vadd.xlane.f32.xlu1 %v138_v13 }
 0x12f   :  { %v128_v14 = vpop.xlane.xlu1 %127 }
 0x130   :  { %239 = vlog2.f32 %v128_v14 }
 0x133   :  { %v140_v15 = vpop.xlane.xlu1 %139 }
 0x134   :  { %v141_v18 = vsub.f32 %v140_v15, %v122_v4 }
 0x13a   :  { %v240_v16 = vpop.eup %239 }
 0x13b   :  { %v130_v17 = vmul.f32 0.6931472, %v240_v16 }
 0x13d   :  { %v142_v19 = vsub.f32 %v141_v18, %v130_v17 }
 0x13f   :  { %v143_v20 = vmul.f32 1.442695, %v142_v19 }
 0x141   :  { %241 = vpow2.f32 %v143_v20 }
 0x14b   :  { %v242_v21 = vpop.eup %241 }
 0x14c   :  { %v145_v22 = vsub.f32 1.0, %v242_v21 }
 0x14e   :  { %v146_v23 = vmul.f32 %v145_v22, %v145_v22 }
 0x150   :  { %v147_v24 = vmul.f32 %v146_v23, %v142_v19 }
 0x152   :  { %v149_v26 = vsub.f32 0.0, %v147_v24 }
 0x154   :  { %v150_v27 = vmul.f32 %v149_v26, %v118_v25 }
 0x156   :  { %v153_v28 = vsel %vm152_vm2, %v150_v27, 0.0 }
 0x157   :  { %154 = vadd.xlane.f32.xlu1 %v153_v28 }
 0x15b   :  { %170 = vadd.xlane.f32.xlu1 %v169_v29 }
 0x1e4   :  { %v155_v31 = vpop.xlane.xlu1 %154 }
 0x1e5   :  { %v156_v32 = vrot.slane %v155_v31, 4 }
 0x1e7   :  { %v157_v33 = vadd.f32 %v156_v32, %v155_v31 }
 0x1e8   :  { %v171_v34 = vpop.xlane.xlu1 %170 }
 0x1e9   :  { %v158_v35 = vrot.slane %v157_v33, 2  ;;  %v172_v36 = vrot.slane %v171_v34, 4 }
 0x1eb   :  { %v173_v37 = vadd.f32 %v172_v36, %v171_v34  ;;  %v159_v38 = vadd.f32 %v158_v35, %v157_v33 }
 0x1ed   :  { %v174_v39 = vrot.slane %v173_v37, 2  ;;  %v160_v40 = vrot.slane %v159_v38, 1 }
 0x1ef   :  { %v175_v41 = vadd.f32 %v174_v39, %v173_v37  ;;  %v161_v42 = vadd.f32 %v160_v40, %v159_v38 }
 0x1f1   :  { %228 = vpush %v161_v42  ;;  %v176_v43 = vrot.slane %v175_v41, 1 }
 0x1f3   :  { %v177_v44 = vadd.f32 %v176_v43, %v175_v41 }
 0x1f5   :  { %230 = vpush %v177_v44 }
 0x222   :  { %s229_s20 = spop %228 }
 0x223   :  { %v163_v46 = vstv %s229_s20 }
 0x224   :  { %v164_v47 = vadd.f32 %v163_v46, %v148_v45 }
 0x226   :  { %166 = vst.msk [vmem:[#allocation2] sm:$0x1] %vm103_vm3, %v164_v47  ;;  %s231_s23 = spop %230 }
 0x227   :  { %v179_v49 = vstv %s231_s23 }
 0x228   :  { %254 = shalt.err (!%p251_p4)
}
 0x229   :  { %s255_s28 = scalar_lea.hbm %s363_s3, 16 }
 0x22a   :  { %p256_p5 = scmp.ne.s32.totalorder %s363_s3, %s255_s28  ;;  %p259_p6 = scmp.lt.u32.totalorder %s255_s28, %s363_s3 }
 0x22c   :  { %p261_p7 = pnand %p259_p6, %p256_p5 }
 0x22e   :  { %264 = shalt.err (!%p261_p7)
}
 0x22f   :  { %191 = dma.vmem_to_hbm [thread:$0]  %s189_s19, 16, %s363_s3, [#allocation3]   ;;  %v180_v50 = vadd.f32 %v179_v49, %v167_v48 }
 0x230   :  { %s265_s9 = scalar_lea.vmem %s199_s22, 16  ;;  %s269_s10 = scalar_lea.vmem %s199_s22, 32 }
 0x231   :  { %181 = vst.msk [vmem:[#allocation4] sm:$0x1] %vm103_vm3, %v180_v50  ;;  %p266_p8 = scmp.ne.s32.totalorder %s199_s22, %s265_s9  ;;  %p270_p9 = scmp.lt.s32.totalorder %s199_s22, %s199_s22 }
 0x232   :  { %p271_p10 = scmp.lt.s32.totalorder %s269_s10, %s265_s9 }
 0x234   :  { %p272_p11 = por %p271_p10, %p270_p9 }
 0x236   :  { %p273_p12 = pnand %p272_p11, %p266_p8 }
 0x238   :  { %276 = shalt.err (!%p273_p12)
}
 0x239   :  { %s277_s13 = scalar_lea.hbm %s364_s4, 16 }
 0x23a   :  { %p278_p13 = scmp.ne.s32.totalorder %s364_s4, %s277_s13  ;;  %p281_p0 = scmp.lt.u32.totalorder %s277_s13, %s364_s4 }
 0x23c   :  { %p283_p1 = pnand %p281_p0, %p278_p13 }
 0x23e   :  { %286 = shalt.err (!%p283_p1)
}
 0x23f   :  { %201 = dma.vmem_to_hbm [thread:$0]  %s199_s22, 16, %s364_s4, [#allocation5]  }
 0x240   :  { %287 = dma.done.wait [#allocation3], 16  }
 0x241   :  { %288 = vsyncadd [#allocation3], 4294967280 }
 0x242   :  { %289 = dma.done.wait [#allocation5], 16  }
 0x243   :  { %290 = vsyncadd [#allocation5], 4294967280 }
 0x244   :  { %208 = vsyncpa [#allocation3], 1 }
 0x245   :  { %209 = vsyncpa [#allocation5], 1 }

</bundles_post_ra>
